<compile_context>
chip_gen: v7x
topology: tpu7x:2x2x1
jax: 0.10.0
libtpu: 0.0.40
codegen_flags: <defaults>
</compile_context>

<pallas_src>
import jax
import jax.numpy as jnp
from jax.experimental import pallas as pl
from jax.experimental.pallas import tpu as pltpu


def feature_embedding_kernel(x_ref, e_ref, w1_ref, b1_ref, w2_ref, b2_ref,
                             wfc_ref, bfc_ref, out_ref):
    # x_ref: (TB, F, 1)  e_ref: (F, H)  w1: (H, A)  b1: (1, A)
    # w2: (A, H)  b2: (1, H)  wfc: (F, O) pre-scaled by 1/H  bfc: (1, O)
    # out_ref: (TB, O)
    TB, F, _ = x_ref.shape
    H = e_ref.shape[1]

    x3 = x_ref[...]                                   # (TB, F, 1)
    E = e_ref[...]                                    # (F, H)

    # embedding: lane-broadcast multiply, then merge (TB, F) -> TB*F rows
    emb3 = x3 * E                                     # (TB, F, H)
    emb = emb3.reshape(TB * F, H)                     # (TB*F, H)  tile-aligned merge

    # attention MLP: two MXU matmuls over all TB*F rows at once
    h1 = jnp.maximum(
        jnp.dot(emb, w1_ref[...], preferred_element_type=jnp.float32)
        + b1_ref[...], 0.0)                           # (TB*F, A)
    attn = jax.nn.sigmoid(
        jnp.dot(h1, w2_ref[...], preferred_element_type=jnp.float32)
        + b2_ref[...])                                # (TB*F, H)

    # rescale, pooled mean over H (1/H folded into wfc), final fc
    rescaled = (emb * attn).reshape(TB, F, H)         # tile-aligned split
    feat = jnp.sum(rescaled, axis=-1)                 # (TB, F)   XLU lane reduce
    out = jnp.dot(feat, wfc_ref[...],
                  preferred_element_type=jnp.float32) + bfc_ref[...]   # (TB, O)

    # leaky_relu (negative_slope = 0.01), single lane-dense store
    out_ref[...] = jnp.where(out >= 0.0, out, 0.01 * out)


def feature_embedding(x, params, *, batch_tile=128):
    E, W1, b1, W2, b2, Wfc, bfc = params
    B, F = x.shape
    H = E.shape[1]
    O = Wfc.shape[1]

    # Single grid step for small batches; tile the batch for large ones so the
    # "parallel" axis can shard across TensorCores.
    TB = B if B <= batch_tile else batch_tile
    assert B % TB == 0, "batch must be divisible by the batch tile"
    grid = (B // TB,)

    x3 = x.astype(jnp.float32).reshape(B, F, 1)            # lane-broadcast layout
    wfc_s = (Wfc.astype(jnp.float32) / jnp.float32(H))     # fold 1/H of the mean

    args = (
        x3,
        E.astype(jnp.float32),
        W1.astype(jnp.float32), b1.reshape(1, -1).astype(jnp.float32),
        W2.astype(jnp.float32), b2.reshape(1, -1).astype(jnp.float32),
        wfc_s, bfc.reshape(1, -1).astype(jnp.float32),
    )

    def full_spec(shape):
        nd = len(shape)
        return pl.BlockSpec(shape, lambda i, _nd=nd: (0,) * _nd)

    in_specs = [pl.BlockSpec((TB, F, 1), lambda i: (i, 0, 0))]   # x tiled over batch
    in_specs += [full_spec(a.shape) for a in args[1:]]           # weights resident

    return pl.pallas_call(
        feature_embedding_kernel,
        out_shape=jax.ShapeDtypeStruct((B, O), jnp.float32),
        grid=grid,
        in_specs=in_specs,
        out_specs=pl.BlockSpec((TB, O), lambda i: (i, 0)),
        compiler_params=pltpu.CompilerParams(
            dimension_semantics=("parallel",)),
    )(*args)


if __name__ == "__main__":
    # small, module-consistent shapes
    feature_size, hidden_size, out_size, reduction_ratio = 16, 32, 32, 4
    attn_size = hidden_size // reduction_ratio
    batch = 2

    key = jax.random.PRNGKey(0)
    ks = jax.random.split(key, 8)
    x   = jax.random.normal(ks[0], (batch, feature_size), jnp.float32)
    E   = jax.random.normal(ks[1], (feature_size, hidden_size), jnp.float32)
    W1  = jax.random.normal(ks[2], (hidden_size, attn_size), jnp.float32) * 0.1
    b1  = jax.random.normal(ks[3], (attn_size,), jnp.float32) * 0.1
    W2  = jax.random.normal(ks[4], (attn_size, hidden_size), jnp.float32) * 0.1
    b2  = jax.random.normal(ks[5], (hidden_size,), jnp.float32) * 0.1
    Wfc = jax.random.normal(ks[6], (feature_size, out_size), jnp.float32) * 0.1
    bfc = jax.random.normal(ks[7], (out_size,), jnp.float32) * 0.1

    params = (E, W1, b1, W2, b2, Wfc, bfc)
    out = jax.block_until_ready(feature_embedding(x, params))

    # pure-JAX reference (matches the PyTorch forward exactly)
    emb  = x[:, :, None] * E[None, :, :]
    h1   = jnp.maximum(emb @ W1 + b1, 0.0)
    attn = jax.nn.sigmoid(h1 @ W2 + b2)
    feat = jnp.mean(emb * attn, axis=-1)
    ref  = feat @ Wfc + bfc
    ref  = jnp.where(ref >= 0, ref, 0.01 * ref)

    assert out.shape == (batch, out_size)
    assert jnp.allclose(out, ref, atol=1e-4, rtol=1e-4)

    print("KERNEL_OK")
</pallas_src>

<mosaic_0001>
module attributes {stable_mosaic.version = 11 : i64} {
  func.func @feature_embedding_kernel(%arg0: i32, %arg1: memref<2x16x1xf32, #tpu.memory_space<vmem>>, %arg2: memref<16x32xf32, #tpu.memory_space<vmem>>, %arg3: memref<32x8xf32, #tpu.memory_space<vmem>>, %arg4: memref<1x8xf32, #tpu.memory_space<vmem>>, %arg5: memref<8x32xf32, #tpu.memory_space<vmem>>, %arg6: memref<1x32xf32, #tpu.memory_space<vmem>>, %arg7: memref<16x32xf32, #tpu.memory_space<vmem>>, %arg8: memref<1x32xf32, #tpu.memory_space<vmem>>, %arg9: memref<2x32xf32, #tpu.memory_space<vmem>>) attributes {dimension_semantics = [#tpu.dimension_semantics<parallel>], iteration_bounds = array<i64: 1>, scalar_prefetch = 0 : i64, scratch_operands = 0 : i64, tpu.core_type = #tpu.core_type<tc>, window_params = [{transform_indices = @transform_0, window_bounds = array<i64: 2, 16, 1>}, {pipeline_mode = #tpu.pipeline_mode<synchronous>, transform_indices = @transform_1, window_bounds = array<i64: 16, 32>}, {pipeline_mode = #tpu.pipeline_mode<synchronous>, transform_indices = @transform_2, window_bounds = array<i64: 32, 8>}, {pipeline_mode = #tpu.pipeline_mode<synchronous>, transform_indices = @transform_3, window_bounds = array<i64: 1, 8>}, {pipeline_mode = #tpu.pipeline_mode<synchronous>, transform_indices = @transform_4, window_bounds = array<i64: 8, 32>}, {pipeline_mode = #tpu.pipeline_mode<synchronous>, transform_indices = @transform_5, window_bounds = array<i64: 1, 32>}, {pipeline_mode = #tpu.pipeline_mode<synchronous>, transform_indices = @transform_6, window_bounds = array<i64: 16, 32>}, {pipeline_mode = #tpu.pipeline_mode<synchronous>, transform_indices = @transform_7, window_bounds = array<i64: 1, 32>}, {transform_indices = @transform_8, window_bounds = array<i64: 2, 32>}]} {
    %c0 = arith.constant 0 : index
    %c0_0 = arith.constant 0 : index
    %c0_1 = arith.constant 0 : index
    %0 = vector.load %arg1[%c0, %c0_0, %c0_1] : memref<2x16x1xf32, #tpu.memory_space<vmem>>, vector<2x16x1xf32>
    %c0_2 = arith.constant 0 : index
    %c0_3 = arith.constant 0 : index
    %1 = vector.load %arg2[%c0_2, %c0_3] : memref<16x32xf32, #tpu.memory_space<vmem>>, vector<16x32xf32>
    %2 = vector.shape_cast %1 : vector<16x32xf32> to vector<1x16x32xf32>
    %3 = vector.broadcast %0 : vector<2x16x1xf32> to vector<2x16x32xf32>
    %4 = vector.broadcast %2 : vector<1x16x32xf32> to vector<2x16x32xf32>
    %5 = arith.mulf %3, %4 : vector<2x16x32xf32>
    %6 = vector.shape_cast %5 : vector<2x16x32xf32> to vector<32x32xf32>
    %c0_4 = arith.constant 0 : index
    %c0_5 = arith.constant 0 : index
    %7 = vector.load %arg3[%c0_4, %c0_5] : memref<32x8xf32, #tpu.memory_space<vmem>>, vector<32x8xf32>
    %cst = arith.constant dense<0.000000e+00> : vector<32x8xf32>
    %8 = tpu.matmul %6, %7, %cst {dimension_numbers = #tpu.dot_dimension_numbers<[1], [0], [0], [1], [0, 0, 1, 1], [], []>} : vector<32x32xf32>, vector<32x8xf32>, vector<32x8xf32> -> vector<32x8xf32>
    %c0_6 = arith.constant 0 : index
    %c0_7 = arith.constant 0 : index
    %9 = vector.load %arg4[%c0_6, %c0_7] : memref<1x8xf32, #tpu.memory_space<vmem>>, vector<1x8xf32>
    %10 = vector.broadcast %9 : vector<1x8xf32> to vector<32x8xf32>
    %11 = arith.addf %8, %10 : vector<32x8xf32>
    %cst_8 = arith.constant 0.000000e+00 : f32
    %12 = vector.broadcast %cst_8 : f32 to vector<32x8xf32>
    %13 = arith.maximumf %11, %12 : vector<32x8xf32>
    %c0_9 = arith.constant 0 : index
    %c0_10 = arith.constant 0 : index
    %14 = vector.load %arg5[%c0_9, %c0_10] : memref<8x32xf32, #tpu.memory_space<vmem>>, vector<8x32xf32>
    %cst_11 = arith.constant dense<0.000000e+00> : vector<32x32xf32>
    %15 = tpu.matmul %13, %14, %cst_11 {dimension_numbers = #tpu.dot_dimension_numbers<[1], [0], [0], [1], [0, 0, 1, 1], [], []>} : vector<32x8xf32>, vector<8x32xf32>, vector<32x32xf32> -> vector<32x32xf32>
    %c0_12 = arith.constant 0 : index
    %c0_13 = arith.constant 0 : index
    %16 = vector.load %arg6[%c0_12, %c0_13] : memref<1x32xf32, #tpu.memory_space<vmem>>, vector<1x32xf32>
    %17 = vector.broadcast %16 : vector<1x32xf32> to vector<32x32xf32>
    %18 = arith.addf %15, %17 : vector<32x32xf32>
    %19 = arith.negf %18 : vector<32x32xf32>
    %20 = math.exp %19 : vector<32x32xf32>
    %cst_14 = arith.constant 1.000000e+00 : f32
    %21 = vector.broadcast %cst_14 : f32 to vector<32x32xf32>
    %22 = arith.addf %21, %20 : vector<32x32xf32>
    %23 = arith.divf %21, %22 : vector<32x32xf32>
    %24 = arith.mulf %6, %23 : vector<32x32xf32>
    %25 = vector.shape_cast %24 : vector<32x32xf32> to vector<2x16x32xf32>
    %cst_15 = arith.constant dense<0.000000e+00> : vector<2x16xf32>
    %26 = vector.multi_reduction <add>, %25, %cst_15 [2] : vector<2x16x32xf32> to vector<2x16xf32>
    %c0_16 = arith.constant 0 : index
    %c0_17 = arith.constant 0 : index
    %27 = vector.load %arg7[%c0_16, %c0_17] : memref<16x32xf32, #tpu.memory_space<vmem>>, vector<16x32xf32>
    %cst_18 = arith.constant dense<0.000000e+00> : vector<2x32xf32>
    %28 = tpu.matmul %26, %27, %cst_18 {dimension_numbers = #tpu.dot_dimension_numbers<[1], [0], [0], [1], [0, 0, 1, 1], [], []>} : vector<2x16xf32>, vector<16x32xf32>, vector<2x32xf32> -> vector<2x32xf32>
    %c0_19 = arith.constant 0 : index
    %c0_20 = arith.constant 0 : index
    %29 = vector.load %arg8[%c0_19, %c0_20] : memref<1x32xf32, #tpu.memory_space<vmem>>, vector<1x32xf32>
    %30 = vector.broadcast %29 : vector<1x32xf32> to vector<2x32xf32>
    %31 = arith.addf %28, %30 : vector<2x32xf32>
    %cst_21 = arith.constant 0.000000e+00 : f32
    %32 = vector.broadcast %cst_21 : f32 to vector<2x32xf32>
    %33 = arith.cmpf oge, %31, %32 : vector<2x32xf32>
    %cst_22 = arith.constant 0.00999999977 : f32
    %34 = vector.broadcast %cst_22 : f32 to vector<2x32xf32>
    %35 = arith.mulf %34, %31 : vector<2x32xf32>
    %36 = arith.select %33, %31, %35 : vector<2x32xi1>, vector<2x32xf32>
    %c0_23 = arith.constant 0 : index
    %c0_24 = arith.constant 0 : index
    %37 = vector.load %arg9[%c0_23, %c0_24] : memref<2x32xf32, #tpu.memory_space<vmem>>, vector<2x32xf32>
    tpu.vector_store %arg9[%c0_23, %c0_24], %36 {strides = array<i32>} : memref<2x32xf32, #tpu.memory_space<vmem>>, vector<2x32xf32>,
    return
  }
  func.func @transform_0(%arg0: i32) -> (i32, i32, i32) {
    %c0_i32 = arith.constant 0 : i32
    %c0_i32_0 = arith.constant 0 : i32
    %c0_i32_1 = arith.constant 0 : i32
    return %arg0, %c0_i32, %c0_i32_0 : i32, i32, i32
  }
  func.func @transform_1(%arg0: i32) -> (i32, i32) {
    %c0_i32 = arith.constant 0 : i32
    %c0_i32_0 = arith.constant 0 : i32
    %c0_i32_1 = arith.constant 0 : i32
    return %c0_i32, %c0_i32_0 : i32, i32
  }
  func.func @transform_2(%arg0: i32) -> (i32, i32) {
    %c0_i32 = arith.constant 0 : i32
    %c0_i32_0 = arith.constant 0 : i32
    %c0_i32_1 = arith.constant 0 : i32
    return %c0_i32, %c0_i32_0 : i32, i32
  }
  func.func @transform_3(%arg0: i32) -> (i32, i32) {
    %c0_i32 = arith.constant 0 : i32
    %c0_i32_0 = arith.constant 0 : i32
    %c0_i32_1 = arith.constant 0 : i32
    return %c0_i32, %c0_i32_0 : i32, i32
  }
  func.func @transform_4(%arg0: i32) -> (i32, i32) {
    %c0_i32 = arith.constant 0 : i32
    %c0_i32_0 = arith.constant 0 : i32
    %c0_i32_1 = arith.constant 0 : i32
    return %c0_i32, %c0_i32_0 : i32, i32
  }
  func.func @transform_5(%arg0: i32) -> (i32, i32) {
    %c0_i32 = arith.constant 0 : i32
    %c0_i32_0 = arith.constant 0 : i32
    %c0_i32_1 = arith.constant 0 : i32
    return %c0_i32, %c0_i32_0 : i32, i32
  }
  func.func @transform_6(%arg0: i32) -> (i32, i32) {
    %c0_i32 = arith.constant 0 : i32
    %c0_i32_0 = arith.constant 0 : i32
    %c0_i32_1 = arith.constant 0 : i32
    return %c0_i32, %c0_i32_0 : i32, i32
  }
  func.func @transform_7(%arg0: i32) -> (i32, i32) {
    %c0_i32 = arith.constant 0 : i32
    %c0_i32_0 = arith.constant 0 : i32
    %c0_i32_1 = arith.constant 0 : i32
    return %c0_i32, %c0_i32_0 : i32, i32
  }
  func.func @transform_8(%arg0: i32) -> (i32, i32) {
    %c0_i32 = arith.constant 0 : i32
    %c0_i32_0 = arith.constant 0 : i32
    return %arg0, %c0_i32 : i32, i32
  }
}

</mosaic_0001>

<bundles_post_ra>
// kernel: tpu_custom_call.1
= control target key start
LH: loop header
LB: loop body
LE: loop exit
PB: predicated region body
PF: predicated region fallthrough
CT: control target
= control target key end

     0   :  { %v567_v2 = vmov 0   ;;  %s697_s0 = inlined_call_operand.vmem [shape: f32[2,16,1], index: 0, kind: input, shape index: {}]   ;;  %s698_s1 = inlined_call_operand.vmem [shape: f32[16,32], index: 1, kind: input, shape index: {}]   ;;  %s699_s2 = inlined_call_operand.vmem [shape: f32[32,8], index: 2, kind: input, shape index: {}]   ;;  %s700_s3 = inlined_call_operand.vmem [shape: f32[1,8], index: 3, kind: input, shape index: {}]   ;;  %s701_s4 = inlined_call_operand.vmem [shape: f32[8,32], index: 4, kind: input, shape index: {}]   ;;  %s702_s5 = inlined_call_operand.vmem [shape: f32[1,32], index: 5, kind: input, shape index: {}]   ;;  %s703_s6 = inlined_call_operand.vmem [shape: f32[16,32], index: 6, kind: input, shape index: {}]   ;;  %s704_s7 = inlined_call_operand.vmem [shape: f32[1,32], index: 7, kind: input, shape index: {}]   ;;  %s705_s8 = inlined_call_operand.hbm [shape: f32[2,32], index: 8, kind: output, shape index: {}]  }
   0x1   :  { %v32_v0 = vld [vmem:[%s697_s0 + $0x10] sm:$0xff]  ;;  %v30_v1 = vld [vmem:[%s697_s0] sm:$0xff]  ;;  %526 = vset.pattern.permute.xlu1 %v567_v2  ;;  %525 = vset.pattern.permute.xlu0 %v567_v2  ;;  %v61_v4 = vld [vmem:[%s699_s2 + $0x8] sm:$0xff] }
   0x2   :  { %v60_v3 = vld [vmem:[%s699_s2] sm:$0xff]  ;;  %48 = vperm.xlu1 %526, %v32_v0   ;;  %38 = vperm.xlu0 %525, %v30_v1   ;;  %v62_v6 = vld [vmem:[%s699_s2 + $0x10] sm:$0xff]  ;;  %v63_v7 = vld [vmem:[%s699_s2 + $0x18] sm:$0xff] }
   0x3   :  { %v509_v5 = vpack.c.bf16 %v61_v4, %v60_v3  ;;  %v33_v8 = vld [vmem:[%s697_s0 + $0x18] sm:$0xff]  ;;  %v31_v9 = vld [vmem:[%s697_s0 + $0x8] sm:$0xff]  ;;  %v513_v10 = vpack.c.bf16 %v63_v7, %v62_v6 }
   0x4   :  { %13 = vsyncpa [#allocation3], 0  ;;  %v34_v11 = vld [vmem:[%s698_s1] sm:$0xff]  ;;  %vm71_vm0 = vcmask 261120   ;;  %v35_v15 = vld [vmem:[%s698_s1 + $0x8] sm:$0xff]  ;;  %vm181_vm1 = vcmask 64512  }
   0x5   :  { %510 = vmatprep.subr.bf16.mxu0 %v509_v5  ;;  %v173_v21 = vld [vmem:[%s701_s4] sm:$0xff]  ;;  %v568_v4 = vmov 0.0|0.0   ;;  %v320_v6 = vld [vmem:[%s703_s6 + $0x8] sm:$0xff]  ;;  %vm569_vm2 = vmmov 0   ;;  %vm343_vm3 = vcmask 130112   ;;  %vm354_vm4 = vcmask 1041409  }
   0x6   :  { %512 = vmatpush3.bf16.msra.mxu0 %v509_v5  ;;  %53 = vperm.xlu1 %526, %v33_v8   ;;  %v448_v22 = vld [vmem:[%s700_s3] ss:$0 sm:$0xff]  ;;  %v570_v8 = vmov 0.0   ;;  %vm356_vm5 = vcmask 130048   ;;  %s571_s30 = smov [#allocation2]   ;;  %vm432_vm7 = vcmask 254976  }
   0x7   :  { %43 = vperm.xlu0 %525, %v31_v9   ;;  %514 = vmatprep.subr.bf16.mxu0 %v513_v10  ;;  %v453_v35 = vld [vmem:[%s702_s5] ss:$0 sm:$0xff]  ;;  %v332_v9 = vlaneseq  ;;  %s440_s9 = sshll.u32 %s571_s30, 4  ;;  %s441_s9 = int_to_ptr.vmem [resolvable:$true] %s440_s9 }
   0x8   :  { %494 = vmatprep.subr.mxu1 %v173_v21  ;;  %v319_v5 = vld [vmem:[%s703_s6] sm:$0xff]  ;;  %s543_s10 = scalar_lea.vmem %s441_s9, 32  ;;  %p548_p1 = scmp.lt.s32.totalorder %s441_s9, %s441_s9 }
   0x9   :  { %495 = vmatpush3.msra.mxu1 %v173_v21  ;;  %v518_v7 = vpack.c.bf16 %v320_v6, %v319_v5  ;;  %p544_p0 = scmp.ne.s32.totalorder %s441_s9, %s543_s10  ;;  %p549_p2 = scmp.lt.s32.totalorder %s543_s10, %s543_s10 }
   0xa   :  { %516 = vmatpush3.bf16.msra.mxu0 %v513_v10  ;;  %517 = vmatprep.subr.bf16.mxu1 %v568_v4  ;;  %v333_v10 = vand.u32 127, %v332_v9 }
   0xb   :  { %p550_p3 = por %p549_p2, %p548_p1 }
   0xd   :  { %p551_p4 = pnand %p550_p3, %p544_p0 }
  0x81   :  { %v49_v12 = vpop.permute.xlu1 %48  ;;  %v39_v13 = vpop.permute.xlu0 %38 }
  0x82   :  { %v644_v14 = vmul.f32 %v39_v13, %v34_v11  ;;  %v651_v16 = vmul.f32 %v49_v12, %v34_v11  ;;  %v335_v11 = vshrl.u32 %v332_v9, 7  ;;  %v338_v12 = vadd.s32 4294967288, %v333_v10 }
  0x84   :  { %488 = vmatprep.mubr.msk.f32.mxu0 %vm71_vm0, %v644_v14 }
  0x85   :  { %v54_v19 = vpop.permute.xlu1 %53 }
  0x86   :  { %v44_v17 = vpop.permute.xlu0 %43  ;;  %v656_v20 = vmul.f32 %v54_v19, %v35_v15 }
  0x87   :  { %v57_v18 = vmul.f32 %v44_v17, %v35_v15  ;;  %v336_v15 = vsub.s32 %v333_v10, %v335_v11 }
  0x89   :  { %489 = vmatmul.mubr.msk.f32.vlgmr.msra.gmra.mrb[0].mxu0 %vm71_vm0, %v57_v18 }
  0x8a   :  { %491 = vmatprep.mubr.msk.f32.mxu0 %vm71_vm0, %v651_v16 }
  0x8d   :  { %492 = vmatmul.mubr.msk.f32.gmra.mrb[2].mxu0 %vm71_vm0, %v656_v20 }
 0x15c   :  { %v490_v23 = vpop.f32.mrb[0].mxu0 }
 0x15d   :  { %v156_v24 = vadd.f32 %v490_v23, %v448_v22  ;;  %v150_v25 = vpop.f32.mrb[1].mxu0 }
 0x15e   :  { %v151_v26 = vadd.f32 %v448_v22, %v150_v25 }
 0x15f   :  { %v170_v29 = vmax.f32 %v156_v24, 0.0 }
 0x160   :  { %v169_v27 = vmax.f32 %v151_v26, 0.0  ;;  %v493_v28 = vpop.f32.mrb[2].mxu0  ;;  %v462_v26 = vld [vmem:[%s704_s7] ss:$0 sm:$0xff] }
 0x161   :  { %v166_v30 = vadd.f32 %v493_v28, %v448_v22  ;;  %v160_v31 = vpop.f32.mrb[3].mxu0 }
 0x162   :  { %v161_v32 = vadd.f32 %v448_v22, %v160_v31  ;;  %496 = vmatprep.mubr.msk.f32.mxu1 %vm181_vm1, %v169_v27 }
 0x163   :  { %497 = vmatmul.mubr.msk.f32.vlgmr.msra.gmra.mrb[0].mxu1 %vm181_vm1, %v170_v29  ;;  %v172_v34 = vmax.f32 %v166_v30, 0.0 }
 0x164   :  { %v171_v33 = vmax.f32 %v161_v32, 0.0  ;;  %519 = vmatpush3.bf16.msra.mxu1 %v518_v7 }
 0x166   :  { %499 = vmatprep.mubr.msk.f32.mxu1 %vm181_vm1, %v171_v33 }
 0x167   :  { %500 = vmatmul.mubr.msk.f32.gmra.mrb[2].mxu1 %vm181_vm1, %v172_v34 }
 0x168   :  { %506 = vmatprep.mubr.msk.f32.mxu1 %vm569_vm2, %v570_v8 }
 0x236   :  { %v498_v36 = vpop.f32.mrb[0].mxu1 }
 0x237   :  { %v266_v37 = vadd.f32 %v498_v36, %v453_v35  ;;  %v260_v38 = vpop.f32.mrb[1].mxu1 }
 0x238   :  { %v261_v39 = vadd.f32 %v453_v35, %v260_v38 }
 0x239   :  { %v459_v40 = vmul.f32 -1.442695, %v266_v37 }
 0x23a   :  { %v458_v41 = vmul.f32 -1.442695, %v261_v39  ;;  %v501_v42 = vpop.f32.mrb[2].mxu1 }
 0x23b   :  { %527 = vpow2.f32 %v459_v40  ;;  %v276_v43 = vadd.f32 %v501_v42, %v453_v35  ;;  %v270_v44 = vpop.f32.mrb[3].mxu1 }
 0x23c   :  { %529 = vpow2.f32 %v458_v41  ;;  %v271_v45 = vadd.f32 %v453_v35, %v270_v44 }
 0x23d   :  { %v461_v46 = vmul.f32 -1.442695, %v276_v43 }
 0x23e   :  { %v460_v47 = vmul.f32 -1.442695, %v271_v45 }
 0x23f   :  { %531 = vpow2.f32 %v461_v46 }
 0x240   :  { %533 = vpow2.f32 %v460_v47 }
 0x245   :  { %v528_v48 = vpop.eup %527 }
 0x246   :  { %v530_v49 = vpop.eup %529  ;;  %v292_v50 = vadd.f32 1.0, %v528_v48 }
 0x247   :  { %v291_v51 = vadd.f32 1.0, %v530_v49 }
 0x248   :  { %535 = vrcp.f32 %v292_v50 }
 0x249   :  { %v532_v52 = vpop.eup %531  ;;  %537 = vrcp.f32 %v291_v51 }
 0x24a   :  { %v534_v53 = vpop.eup %533  ;;  %v294_v54 = vadd.f32 1.0, %v532_v52 }
 0x24b   :  { %v293_v55 = vadd.f32 1.0, %v534_v53 }
 0x24c   :  { %539 = vrcp.f32 %v294_v54 }
 0x24d   :  { %541 = vrcp.f32 %v293_v55 }
 0x252   :  { %v536_v56 = vpop.eup %535 }
 0x253   :  { %v538_v57 = vpop.eup %537  ;;  %v304_v58 = vmul.f32 %v536_v56, %v57_v18 }
 0x254   :  { %v303_v59 = vmul.f32 %v538_v57, %v644_v14  ;;  %v341_v14 = vsub.s32 %v338_v12, %v335_v11 }
 0x255   :  { %v310_v60 = vsel %vm71_vm0, %v304_v58, 0.0 }
 0x256   :  { %v540_v61 = vpop.eup %539  ;;  %311 = vadd.xlane.f32.xlu1 %v310_v60  ;;  %v307_v62 = vsel %vm71_vm0, %v303_v59, 0.0 }
 0x257   :  { %v542_v63 = vpop.eup %541  ;;  %308 = vadd.xlane.f32.xlu0 %v307_v62  ;;  %v306_v2 = vmul.f32 %v540_v61, %v656_v20 }
 0x258   :  { %v305_v0 = vmul.f32 %v542_v63, %v651_v16 }
 0x259   :  { %v316_v3 = vsel %vm71_vm0, %v306_v2, 0.0 }
 0x25a   :  { %v313_v1 = vsel %vm71_vm0, %v305_v0, 0.0 }
 0x25b   :  { %314 = vadd.xlane.f32.xlu0 %v313_v1 }
 0x25f   :  { %317 = vadd.xlane.f32.xlu0 %v316_v3 }
 0x2e3   :  { %v312_v16 = vpop.xlane.xlu1 %311 }
 0x2e4   :  { %v309_v13 = vpop.xlane.xlu0 %308  ;;  %v342_v18 = vrot.slane %v312_v16, %v341_v14 }
 0x2e5   :  { %v337_v19 = vrot.slane %v309_v13, %v336_v15 }
 0x2e7   :  { %v344_v23 = vsel %vm343_vm3, %v342_v18, %v337_v19 }
 0x2e8   :  { %v315_v17 = vpop.xlane.xlu0 %314 }
 0x2e9   :  { %v348_v21 = vrot.slane %v315_v17, %v336_v15 }
 0x2ec   :  { %v318_v20 = vpop.xlane.xlu0 %317 }
 0x2ed   :  { %v352_v22 = vrot.slane %v318_v20, %v341_v14 }
 0x2ef   :  { %v353_v24 = vsel %vm343_vm3, %v352_v22, %v348_v21 }
 0x2f0   :  { %v355_v25 = vsel %vm354_vm4, %v353_v24, %v344_v23 }
 0x2f1   :  { %507 = vmatmul.mubr.msk.f32.vlgmr.msra.gmra.mrb[4].mxu1 %vm356_vm5, %v355_v25 }
 0x3c4   :  { %v425_v27 = vpop.f32.mrb[4].mxu1 }
 0x3c5   :  { %v426_v28 = vadd.f32 %v462_v26, %v425_v27  ;;  %v508_v29 = vpop.f32.mrb[5].mxu1 }
 0x3c7   :  { %v430_v30 = vmul.f32 0.01, %v426_v28  ;;  %vm429_vm6 = vcmp.ge.f32.partialorder %v426_v28, 0.0 }
 0x3c9   :  { %v431_v31 = vsel %vm429_vm6, %v426_v28, %v430_v30 }
 0x3ca   :  { %433 = vst.msk [vmem:[#allocation2] sm:$0x3] %vm432_vm7, %v431_v31 }
 0x3cb   :  { %554 = shalt.err (!%p551_p4)
}
 0x3cc   :  { %s555_s12 = scalar_lea.hbm %s705_s8, 32 }
 0x3cd   :  { %p556_p5 = scmp.ne.s32.totalorder %s705_s8, %s555_s12  ;;  %p559_p6 = scmp.lt.u32.totalorder %s555_s12, %s705_s8 }
 0x3cf   :  { %p561_p7 = pnand %p559_p6, %p556_p5 }
 0x3d1   :  { %564 = shalt.err (!%p561_p7)
}
 0x3d2   :  { %443 = dma.vmem_to_hbm [thread:$0]  %s441_s9, 32, %s705_s8, [#allocation3]  }
 0x3d3   :  { %565 = dma.done.wait [#allocation3], 32  }
 0x3d4   :  { %566 = vsyncadd [#allocation3], 4294967264 }
 0x3d5   :  { %447 = vsyncpa [#allocation3], 1 }

</bundles_post_ra>
